<compile_context>
chip_gen: v7x
topology: tpu7x:2x2x1
jax: 0.10.0
libtpu: 0.0.40
codegen_flags: <defaults>
</compile_context>

<pallas_src>
import jax
import jax.numpy as jnp
import numpy as np
from jax.experimental import pallas as pl
from jax.experimental.pallas import tpu as pltpu


# Padded (lane-aligned) feature sizes for the kernel-side parameter layout.
SELF_PAD = 8      # self_state_dim 6  -> 8  (tiny; do NOT widen to 128)
H1_PAD = 256      # mlp3 layer-1 150  -> 256 (forced by 128-lane constraint)
H2_PAD = 128      # 100 -> 128
H3_PAD = 128      # 100 -> 128


def _round_up(x, m):
    return ((x + m - 1) // m) * m


# ----------------------------- Pallas kernel ---------------------------------
def mlp3_kernel(self_ref, env_ref,
                w1s_ref, w1e_ref, b1_ref,
                w2_ref, b2_ref,
                w3_ref, b3_ref,
                w4t_ref, b4_ref,
                out_ref):
    """Fused 4-layer MLP over one batch tile (weights VMEM-resident).

    Inputs arrive f32 from HBM and are cast to the weight dtype (bf16) on the
    VPU here; accumulation, bias-add and ReLU stay in f32.
    """
    wdt = w1e_ref.dtype

    x_self = self_ref[...].astype(wdt)
    x_env = env_ref[...].astype(wdt)

    # Layer 1: fused concat  h = self @ W1_self + env @ W1_env + b1
    h = (jnp.dot(x_env, w1e_ref[...], preferred_element_type=jnp.float32)
         + jnp.dot(x_self, w1s_ref[...], preferred_element_type=jnp.float32)
         + b1_ref[...])
    h = jnp.maximum(h, 0.0)

    h = jnp.dot(h.astype(wdt), w2_ref[...],
                preferred_element_type=jnp.float32) + b2_ref[...]
    h = jnp.maximum(h, 0.0)

    h = jnp.dot(h.astype(wdt), w3_ref[...],
                preferred_element_type=jnp.float32) + b3_ref[...]
    h = jnp.maximum(h, 0.0)

    # Final layer (single output unit, no ReLU): contract over the feature dim
    # with the result laid out batch-on-lanes:
    #   (1, H3) x (TB, H3) contracted on H3 -> (1, TB)
    # This is the standard q@k^T contraction pattern and avoids both the
    # 128-wide padded W4 matmul and a 512 B/row output writeback.
    v = jax.lax.dot_general(
        w4t_ref[...], h.astype(wdt),
        dimension_numbers=(((1,), (1,)), ((), ())),
        preferred_element_type=jnp.float32)
    v = v + b4_ref[0, 0]                      # scalar bias from SMEM
    out_ref[...] = v.reshape(out_ref.shape)   # (1, TB) -> (1, 1, TB)


# ------------------------- parameter init & kernel layout --------------------
def init_mlp3_params(key, mlp3_input_dim, mlp3_dims):
    """Unpadded f32 params (PyTorch-Linear-like): weight (in, out), bias (1, out)."""
    dims = [mlp3_input_dim] + list(mlp3_dims)
    params = []
    for i in range(len(dims) - 1):
        key, kw, kb = jax.random.split(key, 3)
        fan_in = dims[i]
        scale = 1.0 / np.sqrt(fan_in)
        w = jax.random.uniform(kw, (dims[i], dims[i + 1]),
                               minval=-scale, maxval=scale, dtype=jnp.float32)
        b = jax.random.uniform(kb, (1, dims[i + 1]),
                               minval=-scale, maxval=scale, dtype=jnp.float32)
        params.append((w, b))
    return params


def prepare_kernel_params(params, self_state_dim, env_rep_dim,
                          compute_dtype=jnp.bfloat16):
    """One-time prep: split W1 (self/env), zero-pad to lane-aligned sizes, cast
    weights to the matmul compute dtype (bf16 on all TPU generations).  Biases
    stay f32; padded entries are zero so the ReLU chain is exact."""
    (w1, b1), (w2, b2), (w3, b3), (w4, b4) = params

    def pad2(a, rows, cols):
        return jnp.pad(a, ((0, rows - a.shape[0]), (0, cols - a.shape[1])))

    w1s = pad2(w1[:self_state_dim, :], SELF_PAD, H1_PAD).astype(compute_dtype)
    w1e = pad2(w1[self_state_dim:, :], env_rep_dim, H1_PAD).astype(compute_dtype)
    b1p = pad2(b1, 1, H1_PAD)
    w2p = pad2(w2, H1_PAD, H2_PAD).astype(compute_dtype)
    b2p = pad2(b2, 1, H2_PAD)
    w3p = pad2(w3, H2_PAD, H3_PAD).astype(compute_dtype)
    b3p = pad2(b3, 1, H3_PAD)
    # Final layer: keep only the real output column, transposed to (1, H3_PAD)
    # so the kernel can emit a batch-on-lanes (1, TB) result.
    w4t = pad2(w4[:, :1], H3_PAD, 1).T.astype(compute_dtype)   # (1, H3_PAD)
    b4s = b4[:1, :1].astype(jnp.float32)                       # (1, 1) scalar -> SMEM
    return (w1s, w1e, b1p, w2p, b2p, w3p, b3p, w4t, b4s)


# ------------------------------ forward wrapper -------------------------------
def value_network_forward(state, env_rep, kernel_params, self_state_dim,
                          *, batch_tile=2048):
    """Slice glue in JAX; fused, batch-gridded MLP hot path in Pallas."""
    B = state.shape[0]
    env_dim = env_rep.shape[1]
    (w1s, w1e, b1, w2, b2, w3, b3, w4t, b4) = kernel_params

    # Batch tile: multiple of 16 (bf16 sublane packing).  Aim for >= ~4 grid
    # steps when B is large so dimension_semantics=("parallel",) can shard the
    # batch across both v7x TensorCores and keep the pipeline busy.
    tb = min(int(batch_tile), max(16, _round_up(-(-B // 4), 16)))
    tb = max(16, _round_up(tb, 16))
    b_pad = _round_up(B, tb)
    grid_steps = b_pad // tb
    # TODO(synk): for very large B, a pl.cdiv grid with a partial tail block
    # would avoid the zero-pad pass over env_rep entirely.

    # Glue: slice the self state (tiny; slice + pad fuse into one small op).
    # env_rep is consumed as-is in f32 -- no bf16/pad copy materialized in HBM.
    self_state = state[:, 0, :self_state_dim]
    self_in = jnp.pad(self_state,
                      ((0, b_pad - B), (0, SELF_PAD - self_state_dim)))
    env_in = env_rep if b_pad == B else jnp.pad(env_rep, ((0, b_pad - B), (0, 0)))

    # Advisory cost estimate (padded dims).
    flops = 2 * b_pad * (SELF_PAD * H1_PAD + env_dim * H1_PAD
                         + H1_PAD * H2_PAD + H2_PAD * H3_PAD + H3_PAD * 1)
    weight_args = (w1s, w1e, b1, w2, b2, w3, b3, w4t, b4)
    weight_bytes = sum(int(np.prod(a.shape)) * a.dtype.itemsize
                       for a in weight_args)
    bytes_accessed = (weight_bytes
                      + self_in.size * self_in.dtype.itemsize
                      + env_in.size * env_in.dtype.itemsize
                      + b_pad * 4)

    # VMEM budget: resident weights (double-buffered) + double-buffered
    # activation/output tiles + compiler-staged f32/bf16 intermediates,
    # clamped to a range safe on all generations (v7x physical VMEM = 64 MiB).
    in_itemsize = jnp.dtype(env_in.dtype).itemsize
    tile_in_bytes = tb * (SELF_PAD + env_dim) * in_itemsize
    tile_out_bytes = tb * 4
    interm_bytes = tb * 6 * (H1_PAD + H2_PAD + H3_PAD)   # f32 + bf16 copies
    vmem_limit = int(min(32 * 1024 * 1024,
                         max(16 * 1024 * 1024,
                             2 * weight_bytes
                             + 2 * (tile_in_bytes + tile_out_bytes)
                             + interm_bytes + 4 * 1024 * 1024)))

    out = pl.pallas_call(
        mlp3_kernel,
        out_shape=jax.ShapeDtypeStruct((grid_steps, 1, tb), jnp.float32),
        grid_spec=pltpu.PrefetchScalarGridSpec(
            num_scalar_prefetch=0,
            grid=(grid_steps,),
            in_specs=[
                pl.BlockSpec((tb, SELF_PAD), lambda i: (i, 0)),
                pl.BlockSpec((tb, env_dim), lambda i: (i, 0)),
                # VMEM-resident weights/biases (constant block index).
                pl.BlockSpec(w1s.shape, lambda i: (0, 0)),
                pl.BlockSpec(w1e.shape, lambda i: (0, 0)),
                pl.BlockSpec(b1.shape, lambda i: (0, 0)),
                pl.BlockSpec(w2.shape, lambda i: (0, 0)),
                pl.BlockSpec(b2.shape, lambda i: (0, 0)),
                pl.BlockSpec(w3.shape, lambda i: (0, 0)),
                pl.BlockSpec(b3.shape, lambda i: (0, 0)),
                pl.BlockSpec(w4t.shape, lambda i: (0, 0)),
                # Scalar final bias in SMEM.
                pl.BlockSpec(memory_space=pltpu.MemorySpace.SMEM),
            ],
            out_specs=pl.BlockSpec((1, 1, tb), lambda i: (i, 0, 0)),
        ),
        compiler_params=pltpu.CompilerParams(
            dimension_semantics=("parallel",),
            vmem_limit_bytes=vmem_limit,
        ),
        cost_estimate=pl.CostEstimate(flops=flops, transcendentals=0,
                                      bytes_accessed=bytes_accessed),
    )(self_in, env_in, *weight_args)

    # (grid, 1, tb) batch-on-lanes -> (b_pad, 1); strip batch padding.
    return out.reshape(b_pad, 1)[:B]


# ------------------------------ pure-JAX reference ----------------------------
def reference_forward(state, env_rep, params, self_state_dim):
    self_state = state[:, 0, :self_state_dim]
    h = jnp.concatenate([self_state, env_rep], axis=1)
    n = len(params)
    for i, (w, b) in enumerate(params):
        h = h @ w + b
        if i != n - 1:
            h = jnp.maximum(h, 0.0)
    return h


# ------------------------------------ main ------------------------------------
if __name__ == "__main__":
    # CrowdNav SARL-like configuration (small, deterministic).
    n_humans = 5
    rotated_state_len = 13          # per-human input (mlp1/mlp2/attention path unused)
    self_state_dim = 6
    env_rep_dim = 128               # mlp3_input_dim = 128 + self_state_dim
    mlp3_dims = [150, 100, 100, 1]

    key = jax.random.PRNGKey(0)
    k_state, k_env, k_params = jax.random.split(key, 3)

    params = init_mlp3_params(k_params, env_rep_dim + self_state_dim, mlp3_dims)
    kernel_params = prepare_kernel_params(params, self_state_dim, env_rep_dim,
                                          compute_dtype=jnp.bfloat16)

    def check(batch, batch_tile=2048):
        ks, ke = jax.random.split(jax.random.fold_in(k_state, batch), 2)
        state = jax.random.normal(ks, (batch, n_humans, rotated_state_len),
                                  dtype=jnp.float32)
        env_rep = jax.random.normal(ke, (batch, env_rep_dim), dtype=jnp.float32)

        value = value_network_forward(state, env_rep, kernel_params,
                                      self_state_dim, batch_tile=batch_tile)
        value = jax.block_until_ready(value)

        ref = reference_forward(state, env_rep, params, self_state_dim)
        # bf16 matmul inputs + f32 accumulation -> loose tolerance vs f32 ref.
        np.testing.assert_allclose(np.asarray(value), np.asarray(ref),
                                   rtol=5e-2, atol=5e-2)

    check(batch=2)                    # single-tile path
    check(batch=40, batch_tile=16)    # multi-step grid path (grid > 1)
    check(batch=300)                  # >=4 grid steps + batch padding path

    print("KERNEL_OK")
</pallas_src>

<mosaic_0001>
module attributes {stable_mosaic.version = 11 : i64} {
  func.func @mlp3_kernel(%arg0: i32, %arg1: memref<16x8xf32, #tpu.memory_space<vmem>>, %arg2: memref<16x128xf32, #tpu.memory_space<vmem>>, %arg3: memref<8x256xbf16, #tpu.memory_space<vmem>>, %arg4: memref<128x256xbf16, #tpu.memory_space<vmem>>, %arg5: memref<1x256xf32, #tpu.memory_space<vmem>>, %arg6: memref<256x128xbf16, #tpu.memory_space<vmem>>, %arg7: memref<1x128xf32, #tpu.memory_space<vmem>>, %arg8: memref<128x128xbf16, #tpu.memory_space<vmem>>, %arg9: memref<1x128xf32, #tpu.memory_space<vmem>>, %arg10: memref<1x128xbf16, #tpu.memory_space<vmem>>, %arg11: memref<1x1xf32, #tpu.memory_space<smem>>, %arg12: memref<1x1x16xf32, #tpu.memory_space<vmem>>) attributes {dimension_semantics = [#tpu.dimension_semantics<parallel>], iteration_bounds = array<i64: 1>, scalar_prefetch = 0 : i64, scratch_operands = 0 : i64, tpu.core_type = #tpu.core_type<tc>, window_params = [{transform_indices = @transform_0, window_bounds = array<i64: 16, 8>}, {transform_indices = @transform_1, window_bounds = array<i64: 16, 128>}, {pipeline_mode = #tpu.pipeline_mode<synchronous>, transform_indices = @transform_2, window_bounds = array<i64: 8, 256>}, {pipeline_mode = #tpu.pipeline_mode<synchronous>, transform_indices = @transform_3, window_bounds = array<i64: 128, 256>}, {pipeline_mode = #tpu.pipeline_mode<synchronous>, transform_indices = @transform_4, window_bounds = array<i64: 1, 256>}, {pipeline_mode = #tpu.pipeline_mode<synchronous>, transform_indices = @transform_5, window_bounds = array<i64: 256, 128>}, {pipeline_mode = #tpu.pipeline_mode<synchronous>, transform_indices = @transform_6, window_bounds = array<i64: 1, 128>}, {pipeline_mode = #tpu.pipeline_mode<synchronous>, transform_indices = @transform_7, window_bounds = array<i64: 128, 128>}, {pipeline_mode = #tpu.pipeline_mode<synchronous>, transform_indices = @transform_8, window_bounds = array<i64: 1, 128>}, {pipeline_mode = #tpu.pipeline_mode<synchronous>, transform_indices = @transform_9, window_bounds = array<i64: 1, 128>}, {transform_indices = @transform_10, window_bounds = array<i64: 1, 1>}, {transform_indices = @transform_11, window_bounds = array<i64: 1, 1, 16>}]} {
    %c0 = arith.constant 0 : index
    %c0_0 = arith.constant 0 : index
    %0 = vector.load %arg1[%c0, %c0_0] : memref<16x8xf32, #tpu.memory_space<vmem>>, vector<16x8xf32>
    %1 = arith.truncf %0 : vector<16x8xf32> to vector<16x8xbf16>
    %c0_1 = arith.constant 0 : index
    %c0_2 = arith.constant 0 : index
    %2 = vector.load %arg2[%c0_1, %c0_2] : memref<16x128xf32, #tpu.memory_space<vmem>>, vector<16x128xf32>
    %3 = arith.truncf %2 : vector<16x128xf32> to vector<16x128xbf16>
    %c0_3 = arith.constant 0 : index
    %c0_4 = arith.constant 0 : index
    %4 = vector.load %arg4[%c0_3, %c0_4] : memref<128x256xbf16, #tpu.memory_space<vmem>>, vector<128x256xbf16>
    %cst = arith.constant dense<0.000000e+00> : vector<16x256xf32>
    %5 = tpu.matmul %3, %4, %cst {dimension_numbers = #tpu.dot_dimension_numbers<[1], [0], [0], [1], [0, 0, 1, 1], [], []>} : vector<16x128xbf16>, vector<128x256xbf16>, vector<16x256xf32> -> vector<16x256xf32>
    %c0_5 = arith.constant 0 : index
    %c0_6 = arith.constant 0 : index
    %6 = vector.load %arg3[%c0_5, %c0_6] : memref<8x256xbf16, #tpu.memory_space<vmem>>, vector<8x256xbf16>
    %cst_7 = arith.constant dense<0.000000e+00> : vector<16x256xf32>
    %7 = tpu.matmul %1, %6, %cst_7 {dimension_numbers = #tpu.dot_dimension_numbers<[1], [0], [0], [1], [0, 0, 1, 1], [], []>} : vector<16x8xbf16>, vector<8x256xbf16>, vector<16x256xf32> -> vector<16x256xf32>
    %8 = arith.addf %5, %7 : vector<16x256xf32>
    %c0_8 = arith.constant 0 : index
    %c0_9 = arith.constant 0 : index
    %9 = vector.load %arg5[%c0_8, %c0_9] : memref<1x256xf32, #tpu.memory_space<vmem>>, vector<1x256xf32>
    %10 = vector.broadcast %9 : vector<1x256xf32> to vector<16x256xf32>
    %11 = arith.addf %8, %10 : vector<16x256xf32>
    %cst_10 = arith.constant 0.000000e+00 : f32
    %12 = vector.broadcast %cst_10 : f32 to vector<16x256xf32>
    %13 = arith.maximumf %11, %12 : vector<16x256xf32>
    %14 = arith.truncf %13 : vector<16x256xf32> to vector<16x256xbf16>
    %c0_11 = arith.constant 0 : index
    %c0_12 = arith.constant 0 : index
    %15 = vector.load %arg6[%c0_11, %c0_12] : memref<256x128xbf16, #tpu.memory_space<vmem>>, vector<256x128xbf16>
    %cst_13 = arith.constant dense<0.000000e+00> : vector<16x128xf32>
    %16 = tpu.matmul %14, %15, %cst_13 {dimension_numbers = #tpu.dot_dimension_numbers<[1], [0], [0], [1], [0, 0, 1, 1], [], []>} : vector<16x256xbf16>, vector<256x128xbf16>, vector<16x128xf32> -> vector<16x128xf32>
    %c0_14 = arith.constant 0 : index
    %c0_15 = arith.constant 0 : index
    %17 = vector.load %arg7[%c0_14, %c0_15] : memref<1x128xf32, #tpu.memory_space<vmem>>, vector<1x128xf32>
    %18 = vector.broadcast %17 : vector<1x128xf32> to vector<16x128xf32>
    %19 = arith.addf %16, %18 : vector<16x128xf32>
    %cst_16 = arith.constant 0.000000e+00 : f32
    %20 = vector.broadcast %cst_16 : f32 to vector<16x128xf32>
    %21 = arith.maximumf %19, %20 : vector<16x128xf32>
    %22 = arith.truncf %21 : vector<16x128xf32> to vector<16x128xbf16>
    %c0_17 = arith.constant 0 : index
    %c0_18 = arith.constant 0 : index
    %23 = vector.load %arg8[%c0_17, %c0_18] : memref<128x128xbf16, #tpu.memory_space<vmem>>, vector<128x128xbf16>
    %cst_19 = arith.constant dense<0.000000e+00> : vector<16x128xf32>
    %24 = tpu.matmul %22, %23, %cst_19 {dimension_numbers = #tpu.dot_dimension_numbers<[1], [0], [0], [1], [0, 0, 1, 1], [], []>} : vector<16x128xbf16>, vector<128x128xbf16>, vector<16x128xf32> -> vector<16x128xf32>
    %c0_20 = arith.constant 0 : index
    %c0_21 = arith.constant 0 : index
    %25 = vector.load %arg9[%c0_20, %c0_21] : memref<1x128xf32, #tpu.memory_space<vmem>>, vector<1x128xf32>
    %26 = vector.broadcast %25 : vector<1x128xf32> to vector<16x128xf32>
    %27 = arith.addf %24, %26 : vector<16x128xf32>
    %cst_22 = arith.constant 0.000000e+00 : f32
    %28 = vector.broadcast %cst_22 : f32 to vector<16x128xf32>
    %29 = arith.maximumf %27, %28 : vector<16x128xf32>
    %c0_23 = arith.constant 0 : index
    %c0_24 = arith.constant 0 : index
    %30 = vector.load %arg10[%c0_23, %c0_24] : memref<1x128xbf16, #tpu.memory_space<vmem>>, vector<1x128xbf16>
    %31 = arith.truncf %29 : vector<16x128xf32> to vector<16x128xbf16>
    %cst_25 = arith.constant dense<0.000000e+00> : vector<1x16xf32>
    %32 = tpu.matmul %30, %31, %cst_25 {dimension_numbers = #tpu.dot_dimension_numbers<[1], [1], [0], [0], [0, 0, 1, 0], [], []>} : vector<1x128xbf16>, vector<16x128xbf16>, vector<1x16xf32> -> vector<1x16xf32>
    %c0_26 = arith.constant 0 : index
    %c0_27 = arith.constant 0 : index
    %33 = memref.load %arg11[%c0_26, %c0_27] : memref<1x1xf32, #tpu.memory_space<smem>>
    %34 = vector.broadcast %33 : f32 to vector<1x16xf32>
    %35 = arith.addf %32, %34 : vector<1x16xf32>
    %36 = vector.shape_cast %35 : vector<1x16xf32> to vector<1x1x16xf32>
    %c0_28 = arith.constant 0 : index
    %c0_29 = arith.constant 0 : index
    %c0_30 = arith.constant 0 : index
    %37 = vector.load %arg12[%c0_28, %c0_29, %c0_30] : memref<1x1x16xf32, #tpu.memory_space<vmem>>, vector<1x1x16xf32>
    tpu.vector_store %arg12[%c0_28, %c0_29, %c0_30], %36 {strides = array<i32>} : memref<1x1x16xf32, #tpu.memory_space<vmem>>, vector<1x1x16xf32>,
    return
  }
  func.func @transform_0(%arg0: i32) -> (i32, i32) {
    %c0_i32 = arith.constant 0 : i32
    %c0_i32_0 = arith.constant 0 : i32
    return %arg0, %c0_i32 : i32, i32
  }
  func.func @transform_1(%arg0: i32) -> (i32, i32) {
    %c0_i32 = arith.constant 0 : i32
    %c0_i32_0 = arith.constant 0 : i32
    return %arg0, %c0_i32 : i32, i32
  }
  func.func @transform_2(%arg0: i32) -> (i32, i32) {
    %c0_i32 = arith.constant 0 : i32
    %c0_i32_0 = arith.constant 0 : i32
    %c0_i32_1 = arith.constant 0 : i32
    return %c0_i32, %c0_i32_0 : i32, i32
  }
  func.func @transform_3(%arg0: i32) -> (i32, i32) {
    %c0_i32 = arith.constant 0 : i32
    %c0_i32_0 = arith.constant 0 : i32
    %c0_i32_1 = arith.constant 0 : i32
    return %c0_i32, %c0_i32_0 : i32, i32
  }
  func.func @transform_4(%arg0: i32) -> (i32, i32) {
    %c0_i32 = arith.constant 0 : i32
    %c0_i32_0 = arith.constant 0 : i32
    %c0_i32_1 = arith.constant 0 : i32
    return %c0_i32, %c0_i32_0 : i32, i32
  }
  func.func @transform_5(%arg0: i32) -> (i32, i32) {
    %c0_i32 = arith.constant 0 : i32
    %c0_i32_0 = arith.constant 0 : i32
    %c0_i32_1 = arith.constant 0 : i32
    return %c0_i32, %c0_i32_0 : i32, i32
  }
  func.func @transform_6(%arg0: i32) -> (i32, i32) {
    %c0_i32 = arith.constant 0 : i32
    %c0_i32_0 = arith.constant 0 : i32
    %c0_i32_1 = arith.constant 0 : i32
    return %c0_i32, %c0_i32_0 : i32, i32
  }
  func.func @transform_7(%arg0: i32) -> (i32, i32) {
    %c0_i32 = arith.constant 0 : i32
    %c0_i32_0 = arith.constant 0 : i32
    %c0_i32_1 = arith.constant 0 : i32
    return %c0_i32, %c0_i32_0 : i32, i32
  }
  func.func @transform_8(%arg0: i32) -> (i32, i32) {
    %c0_i32 = arith.constant 0 : i32
    %c0_i32_0 = arith.constant 0 : i32
    %c0_i32_1 = arith.constant 0 : i32
    return %c0_i32, %c0_i32_0 : i32, i32
  }
  func.func @transform_9(%arg0: i32) -> (i32, i32) {
    %c0_i32 = arith.constant 0 : i32
    %c0_i32_0 = arith.constant 0 : i32
    %c0_i32_1 = arith.constant 0 : i32
    return %c0_i32, %c0_i32_0 : i32, i32
  }
  func.func @transform_10(%arg0: i32) -> (i32, i32) {
    %c0_i32 = arith.constant 0 : i32
    %c0_i32_0 = arith.constant 0 : i32
    %c0_i32_1 = arith.constant 0 : i32
    return %c0_i32, %c0_i32_0 : i32, i32
  }
  func.func @transform_11(%arg0: i32) -> (i32, i32, i32) {
    %c0_i32 = arith.constant 0 : i32
    %c0_i32_0 = arith.constant 0 : i32
    %c0_i32_1 = arith.constant 0 : i32
    return %arg0, %c0_i32, %c0_i32_0 : i32, i32, i32
  }
}

</mosaic_0001>

<bundles_post_ra>
// kernel: tpu_custom_call.1
= control target key start
LH: loop header
LB: loop body
LE: loop exit
PB: predicated region body
PF: predicated region fallthrough
CT: control target
= control target key end

     0   :  { %17 = vsyncpa [#allocation4], 0  ;;  %s1083_s0 = inlined_call_operand.vmem [shape: f32[16,8], index: 0, kind: input, shape index: {}]   ;;  %s1084_s1 = inlined_call_operand.vmem [shape: f32[16,128], index: 1, kind: input, shape index: {}]   ;;  %s1085_s2 = inlined_call_operand.vmem [shape: bf16[8,256], index: 2, kind: input, shape index: {}]   ;;  %s1086_s3 = inlined_call_operand.hbm [shape: bf16[128,256], index: 3, kind: input, shape index: {}]   ;;  %s1087_s4 = inlined_call_operand.vmem [shape: f32[1,256], index: 4, kind: input, shape index: {}]   ;;  %s1088_s5 = inlined_call_operand.hbm [shape: bf16[256,128], index: 5, kind: input, shape index: {}]   ;;  %s1089_s6 = inlined_call_operand.vmem [shape: f32[1,128], index: 6, kind: input, shape index: {}]   ;;  %s1090_s7 = inlined_call_operand.hbm [shape: bf16[128,128], index: 7, kind: input, shape index: {}]   ;;  %s1091_s8 = inlined_call_operand.vmem [shape: f32[1,128], index: 8, kind: input, shape index: {}]   ;;  %s1092_s9 = inlined_call_operand.vmem [shape: bf16[1,128], index: 9, kind: input, shape index: {}]   ;;  %s1093_s10 = inlined_call_operand.<no memory space> [shape: f32[1,1], index: 10, kind: input, shape index: {}]   ;;  %s1094_s11 = inlined_call_operand.hbm [shape: f32[1,1,16], index: 11, kind: output, shape index: {}]  }
   0x1   :  { %18 = vsyncpa [#allocation7], 0 }
   0x2   :  { %19 = vsyncpa [#allocation5], 0  ;;  %s928_s17 = smov [#allocation6]   ;;  %s834_s21 = scalar_lea.hbm %s1088_s5, 2048 }
   0x3   :  { %s45_s18 = sshll.u32 %s928_s17, 4  ;;  %p835_p0 = scmp.ne.s32.totalorder %s1088_s5, %s834_s21  ;;  %s46_s18 = int_to_ptr.vmem [resolvable:$true] %s45_s18 }
   0x4   :  { %p838_p1 = scmp.lt.u32.totalorder %s834_s21, %s1088_s5 }
   0x6   :  { %p840_p2 = pnand %p838_p1, %p835_p0 }
   0x8   :  { %843 = shalt.err (!%p840_p2)
}
   0x9   :  { %s844_s26 = scalar_lea.vmem %s46_s18, 2048  ;;  %p849_p4 = scmp.lt.s32.totalorder %s46_s18, %s46_s18 }
   0xa   :  { %p845_p3 = scmp.ne.s32.totalorder %s46_s18, %s844_s26  ;;  %p850_p5 = scmp.lt.s32.totalorder %s844_s26, %s844_s26 }
   0xc   :  { %p851_p6 = por %p850_p5, %p849_p4 }
   0xe   :  { %p852_p7 = pnand %p851_p6, %p845_p3 }
  0x10   :  { %855 = shalt.err (!%p852_p7)
}
  0x11   :  { %s929_s27 = smov 64   ;;  %s930_s28 = smov 4  }
  0x12   :  { %51 = dma.hbm_to_vmem [thread:$0]  %s1088_s5, 2048, %s46_s18, [#allocation7], %s929_s27, %s929_s27, %s930_s28  }
  0x13   :  { %s931_s12 = smov [#allocation3]   ;;  %s856_s16 = scalar_lea.hbm %s1086_s3, 2048 }
  0x14   :  { %s31_s13 = sshll.u32 %s931_s12, 4  ;;  %p857_p8 = scmp.ne.s32.totalorder %s1086_s3, %s856_s16  ;;  %s32_s13 = int_to_ptr.vmem [resolvable:$true] %s31_s13 }
  0x15   :  { %p860_p9 = scmp.lt.u32.totalorder %s856_s16, %s1086_s3 }
  0x17   :  { %p862_p10 = pnand %p860_p9, %p857_p8 }
  0x19   :  { %865 = shalt.err (!%p862_p10)
}
  0x1a   :  { %s866_s22 = scalar_lea.vmem %s32_s13, 2048  ;;  %p871_p12 = scmp.lt.s32.totalorder %s32_s13, %s32_s13 }
  0x1b   :  { %p867_p11 = scmp.ne.s32.totalorder %s32_s13, %s866_s22  ;;  %p872_p13 = scmp.lt.s32.totalorder %s866_s22, %s866_s22 }
  0x1d   :  { %p873_p0 = por %p872_p13, %p871_p12 }
  0x1f   :  { %p874_p1 = pnand %p873_p0, %p867_p11 }
  0x21   :  { %877 = shalt.err (!%p874_p1)
}
  0x22   :  { %s932_s5 = smov 128   ;;  %s933_s18 = smov 8  }
  0x23   :  { %37 = dma.hbm_to_vmem [thread:$0]  %s1086_s3, 2048, %s32_s13, [#allocation4], %s932_s5, %s932_s5, %s933_s18  }
  0x24   :  { %s934_s25 = smov [#allocation8]   ;;  %s878_s12 = scalar_lea.hbm %s1090_s7, 1024 }
  0x25   :  { %s59_s26 = sshll.u32 %s934_s25, 4  ;;  %p879_p2 = scmp.ne.s32.totalorder %s1090_s7, %s878_s12  ;;  %s60_s26 = int_to_ptr.vmem [resolvable:$true] %s59_s26 }
  0x26   :  { %p882_p3 = scmp.lt.u32.totalorder %s878_s12, %s1090_s7 }
  0x28   :  { %p884_p4 = pnand %p882_p3, %p879_p2 }
  0x2a   :  { %887 = shalt.err (!%p884_p4)
}
  0x2b   :  { %s888_s19 = scalar_lea.vmem %s60_s26, 1024  ;;  %p893_p6 = scmp.lt.s32.totalorder %s60_s26, %s60_s26 }
  0x2c   :  { %p889_p5 = scmp.ne.s32.totalorder %s60_s26, %s888_s19  ;;  %p894_p7 = scmp.lt.s32.totalorder %s888_s19, %s888_s19 }
  0x2e   :  { %p895_p8 = por %p894_p7, %p893_p6 }
  0x30   :  { %p896_p9 = pnand %p895_p8, %p889_p5 }
  0x32   :  { %899 = shalt.err (!%p896_p9)
}
  0x33   :  { %65 = dma.hbm_to_vmem [thread:$0]  %s1090_s7, 1024, %s60_s26, [#allocation7], %s929_s27, %s929_s27, %s930_s28  }
  0x34   :  { %922 = dma.done.wait [#allocation4], 2048  }
  0x35   :  { %923 = vsyncadd [#allocation4], 4294965248 }
  0x36   :  { %924 = dma.done.wait [#allocation7], 3072  }
  0x37   :  { %925 = vsyncadd [#allocation7], 4294964224  ;;  %v935_v0 = vmov 0   ;;  %v104_v1 = vld [vmem:[%s1085_s2] sm:$0xff]  ;;  %vm114_vm0 = vcmask 1043456   ;;  %v83_v6 = vld [vmem:[%s1083_s0 + $0x8] sm:$0xff]  ;;  %v289_v44 = vlaneseq }
  0x38   :  { %153 = vmatprep.mubr.bf16.mxu0 %v935_v0  ;;  %v665_v2 = vcombine.high %v104_v1, %v104_v1  ;;  %v664_v3 = vcombine.low %v104_v1, %v104_v1  ;;  %v788_v4 = vld [vmem:[#allocation3 + $0x4] ss:$8 sps:$4 sm:$0xff]   ;;  %v786_v9 = vld [vmem:[#allocation3] ss:$8 sps:$4 sm:$0xff]   ;;  %vm110_vm1 = vcmask 64512   ;;  %v814_v21 = vld [vmem:[#allocation6 + $0x50] sm:$0xff]  }
  0x39   :  { %v82_v5 = vld [vmem:[%s1083_s0] sm:$0xff]  ;;  %v791_v10 = vld [vmem:[#allocation3 + $0x14] ss:$8 sps:$4 sm:$0xff]   ;;  %v789_v11 = vld [vmem:[#allocation3 + $0x10] ss:$8 sps:$4 sm:$0xff]   ;;  %v936_v43 = vmov 0.0  }
  0x3a   :  { %666 = vmatprep.subr.msk.bf16.mxu0 %vm114_vm0, %v665_v2  ;;  %v116_v7 = vsel %vm114_vm0, %v664_v3, 0  ;;  %v84_v8 = vpack.c.bf16 %v83_v6, %v82_v5  ;;  %v794_v12 = vld [vmem:[#allocation3 + $0x24] ss:$8 sps:$4 sm:$0xff]   ;;  %v792_v13 = vld [vmem:[#allocation3 + $0x20] ss:$8 sps:$4 sm:$0xff]   ;;  %v815_v24 = vld [vmem:[#allocation6 + $0x10] sm:$0xff]  }
  0x3b   :  { %122 = vmatpush1.bf16.msra.mxu0 %v116_v7  ;;  %v797_v14 = vld [vmem:[#allocation3 + $0x34] ss:$8 sps:$4 sm:$0xff]   ;;  %v810_v15 = vld [vmem:[#allocation6 + $0x40] sm:$0xff]   ;;  %v795_v16 = vld [vmem:[#allocation3 + $0x30] ss:$8 sps:$4 sm:$0xff]   ;;  %v290_v45 = vshrl.u32 %v289_v44, 7 }
  0x3c   :  { %244 = vmatprep.subr.bf16.mxu0 %v788_v4  ;;  %v811_v17 = vld [vmem:[#allocation6] sm:$0xff]   ;;  %710 = vmatprep.subr.bf16.mxu1 %v810_v15  ;;  %v812_v19 = vld [vmem:[#allocation6 + $0x48] sm:$0xff]   ;;  %v803_v23 = vld [vmem:[#allocation3 + $0x54] ss:$8 sps:$4 sm:$0xff]   ;;  %vm937_vm2 = vmmov 0   ;;  %vm646_vm3 = vcmask 122880  }
  0x3d   :  { %v800_v18 = vld [vmem:[#allocation3 + $0x44] ss:$8 sps:$4 sm:$0xff]   ;;  %711 = vmatpush3.bf16.msra.mxu1 %v811_v17  ;;  %v798_v22 = vld [vmem:[#allocation3 + $0x40] ss:$8 sps:$4 sm:$0xff]   ;;  %v816_v25 = vld [vmem:[#allocation6 + $0x58] sm:$0xff]   ;;  %v291_v46 = vsub.s32 0, %v290_v45 }
  0x3e   :  { %667 = vmatmul.mubr.msk.bf16.vlgmr.msra.gmra.mrb[0].mxu0 %vm110_vm1, %v84_v8  ;;  %v813_v20 = vld [vmem:[#allocation6 + $0x8] sm:$0xff]   ;;  %712 = vmatprep.subr.bf16.mxu1 %v812_v19  ;;  %v801_v26 = vld [vmem:[#allocation3 + $0x50] ss:$8 sps:$4 sm:$0xff]   ;;  %v818_v29 = vld [vmem:[#allocation6 + $0x60] sm:$0xff]   ;;  %v295_v48 = vsub.s32 1, %v290_v45 }
  0x3f   :  { %245 = vmatpush1.bf16.msra.mxu0 %v786_v9  ;;  %276 = vmatprep.mubr.bf16.mxu0 %v935_v0  ;;  %v817_v27 = vld [vmem:[#allocation6 + $0x18] sm:$0xff]   ;;  %v806_v28 = vld [vmem:[#allocation3 + $0x64] ss:$8 sps:$4 sm:$0xff]   ;;  %v804_v30 = vld [vmem:[#allocation3 + $0x60] ss:$8 sps:$4 sm:$0xff]  }
  0x40   :  { %246 = vmatprep.subr.bf16.mxu0 %v791_v10  ;;  %v819_v31 = vld [vmem:[#allocation6 + $0x20] sm:$0xff]   ;;  %v809_v32 = vld [vmem:[#allocation3 + $0x74] ss:$8 sps:$4 sm:$0xff]   ;;  %v820_v33 = vld [vmem:[#allocation6 + $0x68] sm:$0xff]  }
  0x41   :  { %713 = vmatpush3.bf16.msra.mxu1 %v813_v20  ;;  %v807_v34 = vld [vmem:[#allocation3 + $0x70] ss:$8 sps:$4 sm:$0xff]   ;;  %v85_v35 = vld [vmem:[%s1084_s1] sm:$0xff]  ;;  %v86_v36 = vld [vmem:[%s1084_s1 + $0x8] sm:$0xff] }
  0x42   :  { %714 = vmatprep.subr.bf16.mxu1 %v814_v21  ;;  %v87_v37 = vpack.c.bf16 %v86_v36, %v85_v35  ;;  %v821_v38 = vld [vmem:[#allocation6 + $0x28] sm:$0xff]   ;;  %v822_v39 = vld [vmem:[#allocation6 + $0x70] sm:$0xff]   ;;  %v824_v41 = vld [vmem:[#allocation6 + $0x78] sm:$0xff]  }
  0x43   :  { %247 = vmatpush1.bf16.msra.mxu0 %v789_v11  ;;  %v823_v40 = vld [vmem:[#allocation6 + $0x30] sm:$0xff]   ;;  %v825_v42 = vld [vmem:[#allocation6 + $0x38] sm:$0xff]   ;;  %v287_v47 = vld [vmem:[%s1087_s4] sm:$0x3] }
  0x44   :  { %248 = vmatprep.subr.bf16.mxu0 %v794_v12  ;;  %v292_v49 = vrot.slane %v287_v47, %v291_v46  ;;  %v296_v50 = vrot.slane %v287_v47, %v295_v48  ;;  %v826_v1 = vld [vmem:[#allocation8] sm:$0xff]   ;;  %v827_v2 = vld [vmem:[#allocation8 + $0x8] sm:$0xff]   ;;  %v828_v3 = vld [vmem:[#allocation8 + $0x10] sm:$0xff]  }
  0x45   :  { %715 = vmatpush3.bf16.msra.mxu1 %v815_v24  ;;  %v829_v4 = vld [vmem:[#allocation8 + $0x18] sm:$0xff]   ;;  %v830_v5 = vld [vmem:[#allocation8 + $0x20] sm:$0xff]   ;;  %v831_v6 = vld [vmem:[#allocation8 + $0x28] sm:$0xff]  }
  0x46   :  { %716 = vmatprep.subr.bf16.mxu1 %v816_v25  ;;  %v832_v7 = vld [vmem:[#allocation8 + $0x30] sm:$0xff]   ;;  %v833_v8 = vld [vmem:[#allocation8 + $0x38] sm:$0xff]   ;;  %v684_v10 = vld [vmem:[%s1089_s6] ss:$0 sm:$0xff] }
  0x47   :  { %249 = vmatpush1.bf16.msra.mxu0 %v792_v13  ;;  %v701_v21 = vld [vmem:[%s1091_s8] ss:$0 sm:$0xff]  ;;  %s938_s8 = smov [#allocation9]  }
  0x48   :  { %250 = vmatprep.subr.bf16.mxu0 %v797_v14  ;;  %s654_s14 = sshll.u32 %s938_s8, 4  ;;  %s655_s14 = int_to_ptr.vmem [resolvable:$true] %s654_s14 }
  0x49   :  { %717 = vmatpush3.bf16.msra.mxu1 %v817_v27  ;;  %s900_s15 = scalar_lea.vmem %s655_s14, 16  ;;  %s904_s16 = scalar_lea.vmem %s655_s14, 32 }
  0x4a   :  { %718 = vmatprep.subr.bf16.mxu1 %v818_v29  ;;  %p901_p10 = scmp.ne.s32.totalorder %s655_s14, %s900_s15  ;;  %p905_p11 = scmp.lt.s32.totalorder %s655_s14, %s655_s14 }
  0x4b   :  { %251 = vmatpush1.bf16.msra.mxu0 %v795_v16  ;;  %p906_p12 = scmp.lt.s32.totalorder %s904_s16, %s900_s15 }
  0x4c   :  { %252 = vmatprep.subr.bf16.mxu0 %v800_v18 }
  0x4d   :  { %719 = vmatpush3.bf16.msra.mxu1 %v819_v31  ;;  %v602_v31 = vld [vmem:[%s1092_s9] sm:$0x1]  ;;  %p907_p13 = por %p906_p12, %p905_p11 }
  0x4e   :  { %720 = vmatprep.subr.bf16.mxu1 %v820_v33 }
  0x4f   :  { %253 = vmatpush1.bf16.msra.mxu0 %v798_v22  ;;  %p908_p0 = pnand %p907_p13, %p901_p10 }
  0x50   :  { %254 = vmatprep.subr.bf16.mxu0 %v803_v23 }
  0x51   :  { %721 = vmatpush3.bf16.msra.mxu1 %v821_v38 }
  0x52   :  { %722 = vmatprep.subr.bf16.mxu1 %v822_v39 }
  0x53   :  { %255 = vmatpush1.bf16.msra.mxu0 %v801_v26 }
  0x54   :  { %256 = vmatprep.subr.bf16.mxu0 %v806_v28 }
  0x55   :  { %723 = vmatpush3.bf16.msra.mxu1 %v823_v40 }
  0x56   :  { %724 = vmatprep.subr.bf16.mxu1 %v824_v41 }
  0x57   :  { %257 = vmatpush1.bf16.msra.mxu0 %v804_v30 }
  0x58   :  { %258 = vmatprep.subr.bf16.mxu0 %v809_v32  ;;  %v605_v32 = vstv %s1093_s10 }
  0x59   :  { %725 = vmatpush3.bf16.msra.mxu1 %v825_v42 }
  0x5a   :  { %743 = vmatprep.subr.bf16.mxu1 %v936_v43 }
  0x5b   :  { %259 = vmatpush1.bf16.msra.mxu0 %v807_v34 }
  0x5c   :  { %763 = vmatprep.subr.bf16.mxu0 %v936_v43 }
  0x5e   :  { %277 = vmatmul.mubr.bf16.vlgmr.msra.gmra.mrb[0].mxu0 %v87_v37 }
  0x5f   :  { %765 = vmatprep.mubr.msk.bf16.mxu0 %vm937_vm2, %v936_v43 }
 0x131   :  { %v278_v51 = vpop.f32.mrb[0].mxu0 }
 0x132   :  { %v299_v52 = vadd.f32 %v292_v49, %v278_v51  ;;  %v280_v53 = vpop.f32.mrb[1].mxu0 }
 0x133   :  { %v300_v54 = vadd.f32 %v296_v50, %v280_v53  ;;  %v282_v55 = vpop.f32.mrb[2].mxu0 }
 0x134   :  { %v301_v56 = vadd.f32 %v292_v49, %v282_v55  ;;  %v284_v57 = vpop.f32.mrb[3].mxu0  ;;  %v303_v59 = vmax.f32 %v299_v52, 0.0 }
 0x135   :  { %v302_v58 = vadd.f32 %v296_v50, %v284_v57  ;;  %v304_v61 = vmax.f32 %v300_v54, 0.0 }
 0x136   :  { %v305_v60 = vmax.f32 %v301_v56, 0.0 }
 0x137   :  { %v306_v62 = vmax.f32 %v302_v58, 0.0 }
 0x138   :  { %v307_v63 = vpack.c.bf16 %v305_v60, %v303_v59 }
 0x139   :  { %v308_v0 = vpack.c.bf16 %v306_v62, %v304_v61 }
 0x13b   :  { %476 = vmatprep.mubr.bf16.mxu1 %v308_v0 }
 0x13c   :  { %477 = vmatmul.mubr.bf16.vlgmr.msra.gmra.mrb[0].mxu1 %v307_v63 }
 0x13d   :  { %744 = vmatpush3.bf16.msra.mxu1 %v826_v1  ;;  %759 = vmatprep.mubr.msk.bf16.mxu1 %vm937_vm2, %v936_v43 }
 0x13e   :  { %745 = vmatprep.subr.bf16.mxu1 %v936_v43 }
 0x141   :  { %746 = vmatpush3.bf16.msra.mxu1 %v827_v2 }
 0x142   :  { %747 = vmatprep.subr.bf16.mxu1 %v936_v43 }
 0x145   :  { %748 = vmatpush3.bf16.msra.mxu1 %v828_v3 }
 0x146   :  { %749 = vmatprep.subr.bf16.mxu1 %v936_v43 }
 0x149   :  { %750 = vmatpush3.bf16.msra.mxu1 %v829_v4 }
 0x14a   :  { %751 = vmatprep.subr.bf16.mxu1 %v936_v43 }
 0x14d   :  { %752 = vmatpush3.bf16.msra.mxu1 %v830_v5 }
 0x14e   :  { %753 = vmatprep.subr.bf16.mxu1 %v936_v43 }
 0x151   :  { %754 = vmatpush3.bf16.msra.mxu1 %v831_v6 }
 0x152   :  { %755 = vmatprep.subr.bf16.mxu1 %v936_v43 }
 0x155   :  { %756 = vmatpush3.bf16.msra.mxu1 %v832_v7 }
 0x156   :  { %757 = vmatprep.subr.bf16.mxu1 %v936_v43 }
 0x159   :  { %758 = vmatpush3.bf16.msra.mxu1 %v833_v8 }
 0x20f   :  { %v726_v9 = vpop.f32.mrb[0].mxu1 }
 0x210   :  { %v727_v11 = vpop.f32.mrb[1].mxu1 }
 0x211   :  { %v728_v12 = vadd.f32 %v727_v11, %v726_v9  ;;  %v729_v13 = vpop.f32.mrb[2].mxu1 }
 0x212   :  { %v730_v14 = vpop.f32.mrb[3].mxu1 }
 0x213   :  { %v479_v15 = vadd.f32 %v728_v12, %v684_v10  ;;  %v731_v16 = vadd.f32 %v730_v14, %v729_v13 }
 0x215   :  { %v482_v17 = vadd.f32 %v731_v16, %v684_v10  ;;  %v485_v18 = vmax.f32 %v479_v15, 0.0 }
 0x217   :  { %v486_v19 = vmax.f32 %v482_v17, 0.0 }
 0x219   :  { %v487_v20 = vpack.c.bf16 %v486_v19, %v485_v18 }
 0x21b   :  { %760 = vmatmul.mubr.bf16.vlgmr.msra.gmra.mrb[4].mxu1 %v487_v20 }
 0x2ee   :  { %v593_v22 = vpop.f32.mrb[4].mxu1 }
 0x2ef   :  { %v594_v23 = vadd.f32 %v701_v21, %v593_v22  ;;  %v761_v24 = vpop.f32.mrb[5].mxu1 }
 0x2f0   :  { %v596_v25 = vpop.f32.mrb[6].mxu1 }
 0x2f1   :  { %v597_v26 = vadd.f32 %v701_v21, %v596_v25  ;;  %v762_v27 = vpop.f32.mrb[7].mxu1  ;;  %v600_v28 = vmax.f32 %v594_v23, 0.0 }
 0x2f3   :  { %v601_v29 = vmax.f32 %v597_v26, 0.0 }
 0x2f5   :  { %v603_v30 = vpack.c.bf16 %v601_v29, %v600_v28 }
 0x2f7   :  { %764 = vmatpush3.bf16.xpose.msra.mxu0 %v603_v30 }
 0x2fe   :  { %766 = vmatmul.mubr.bf16.vlgmr.msra.gmra.mrb[4].mxu0 %v602_v31 }
 0x3d1   :  { %v640_v33 = vpop.f32.mrb[4].mxu0 }
 0x3d2   :  { %v641_v34 = vadd.f32 %v640_v33, %v605_v32  ;;  %v767_v35 = vpop.f32.mrb[5].mxu0 }
 0x3d3   :  { %v643_v36 = vpop.f32.mrb[6].mxu0 }
 0x3d4   :  { %v768_v37 = vpop.f32.mrb[7].mxu0  ;;  %647 = vst.msk [vmem:[#allocation9] sm:$0x1] %vm646_vm3, %v641_v34 }
 0x3d5   :  { %911 = shalt.err (!%p908_p0)
}
 0x3d6   :  { %s912_s17 = scalar_lea.hbm %s1094_s11, 16 }
 0x3d7   :  { %p913_p1 = scmp.ne.s32.totalorder %s1094_s11, %s912_s17  ;;  %p916_p2 = scmp.lt.u32.totalorder %s912_s17, %s1094_s11 }
 0x3d9   :  { %p918_p3 = pnand %p916_p2, %p913_p1 }
 0x3db   :  { %921 = shalt.err (!%p918_p3)
}
 0x3dc   :  { %657 = dma.vmem_to_hbm [thread:$0]  %s655_s14, 16, %s1094_s11, [#allocation5]  }
 0x3dd   :  { %926 = dma.done.wait [#allocation5], 16  }
 0x3de   :  { %927 = vsyncadd [#allocation5], 4294967280 }
 0x3df   :  { %661 = vsyncpa [#allocation4], 1 }
 0x3e0   :  { %662 = vsyncpa [#allocation7], 1 }
 0x3e1   :  { %663 = vsyncpa [#allocation5], 1 }

</bundles_post_ra>
